<compile_context>
chip_gen: v5e
topology: v5e:2x2
jax: 0.10.0
libtpu: 0.0.40
codegen_flags: <defaults>
</compile_context>

<pallas_src>
import functools

import jax
import jax.numpy as jnp
from jax import lax
from jax.experimental import pallas as pl
from jax.experimental.pallas import tpu as pltpu

_BF16 = jnp.bfloat16
_F32 = jnp.float32


# ---------------------------------------------------------------------------
# Small-N path: fully fused encoder + decoder in one kernel (everything in VMEM).
# ---------------------------------------------------------------------------
def _fused_small_kernel(x_ref, adj_ref, w1_ref, wcat_ref, noise_ref, a_ref, *, h2):
    adj = adj_ref[...]                                                   # bf16 (N, N)
    xw = jnp.dot(x_ref[...], w1_ref[...], preferred_element_type=_F32)
    hidden = jnp.maximum(
        jnp.dot(adj, xw.astype(_BF16), preferred_element_type=_F32), 0.0)
    hcat = jnp.dot(hidden.astype(_BF16), wcat_ref[...], preferred_element_type=_F32)
    zcat = jnp.dot(adj, hcat.astype(_BF16), preferred_element_type=_F32)
    z = zcat[:, :h2] + jnp.exp(zcat[:, h2:]) * noise_ref[...]
    zb = z.astype(_BF16)
    logits = lax.dot_general(zb, zb, (((1,), (1,)), ((), ())),
                             preferred_element_type=_F32)
    a_ref[...] = jax.nn.sigmoid(logits).astype(a_ref.dtype)


# ---------------------------------------------------------------------------
# Large-N path: row-tiled GCN layers (adj streams through VMEM) + tiled decoder.
# ---------------------------------------------------------------------------
def _gcn1_kernel(adj_ref, x_ref, w1_ref, hid_ref):
    # x @ W1 is tiny and recomputed per row-tile: the tile is HBM-bound on the adj
    # stream, so the redundant MXU work is hidden under the DMA.
    xw = jnp.dot(x_ref[...], w1_ref[...], preferred_element_type=_F32)
    h = jnp.dot(adj_ref[...], xw.astype(_BF16), preferred_element_type=_F32)
    hid_ref[...] = jnp.maximum(h, 0.0).astype(hid_ref.dtype)


def _gcn2_reparam_kernel(adj_ref, hid_ref, wcat_ref, noise_ref, z_ref, *, h2):
    hcat = jnp.dot(hid_ref[...], wcat_ref[...], preferred_element_type=_F32)
    zcat = jnp.dot(adj_ref[...], hcat.astype(_BF16), preferred_element_type=_F32)
    z = zcat[:, :h2] + jnp.exp(zcat[:, h2:]) * noise_ref[...]
    z_ref[...] = z.astype(z_ref.dtype)


def _decoder_kernel(zi_ref, zjt_ref, out_ref):
    # zjt is the pre-transposed z (K, N): the block feeds the MXU in canonical
    # [M,K] x [K,N] form with no per-step re-layout of the RHS tile.
    logits = jnp.dot(zi_ref[...], zjt_ref[...], preferred_element_type=_F32)
    out_ref[...] = jax.nn.sigmoid(logits).astype(out_ref.dtype)


# ---------------------------------------------------------------------------
# Wrappers
# ---------------------------------------------------------------------------
def _forward_fused_small(xb, adjb, w1b, wcb, noise, h2):
    n, f_in = xb.shape
    h1 = w1b.shape[1]
    full = lambda a: pl.BlockSpec(a.shape, lambda: (0,) * a.ndim)
    cost = pl.CostEstimate(
        flops=2 * n * (f_in * h1 + n * h1 + h1 * 2 * h2 + n * 2 * h2 + n * h2),
        transcendentals=n * h2 + n * n,
        bytes_accessed=2 * (2 * n * n + n * f_in + f_in * h1 + h1 * 2 * h2)
        + 4 * n * h2)
    return pl.pallas_call(
        functools.partial(_fused_small_kernel, h2=h2),
        out_shape=jax.ShapeDtypeStruct((n, n), _BF16),
        in_specs=[full(xb), full(adjb), full(w1b), full(wcb), full(noise)],
        out_specs=pl.BlockSpec((n, n), lambda: (0, 0)),
        cost_estimate=cost,
    )(xb, adjb, w1b, wcb, noise)


def _forward_tiled(xb, adjb, w1b, wcb, noise, h2):
    n, f_in = xb.shape
    h1 = w1b.shape[1]
    tm = 256                                    # encoder row tile (sublane-aligned)
    n_pad = ((n + 255) // 256) * 256
    pad = n_pad - n

    # Zero padding keeps the math exact: padded adj rows/cols and padded noise rows
    # are zero -> padded hidden / z rows come out exactly 0 and are sliced away.
    adjp = jnp.pad(adjb, ((0, pad), (0, pad)))
    xp = jnp.pad(xb, ((0, pad), (0, 0)))
    noisep = jnp.pad(noise, ((0, pad), (0, 0)))

    # Explicit scoped-VMEM limit sized from the actual footprint (v5e default is
    # only 16 MiB); capped well inside v7x's 64 MiB physical VMEM.
    enc_bytes = 2 * (2 * tm * n_pad) + 2 * n_pad * (f_in + h1) + (4 << 20)
    enc_params = pltpu.CompilerParams(
        dimension_semantics=("parallel",),
        vmem_limit_bytes=int(min(max(2 * enc_bytes, 16 << 20), 48 << 20)))

    hidden = pl.pallas_call(
        _gcn1_kernel,
        out_shape=jax.ShapeDtypeStruct((n_pad, h1), _BF16),
        grid=(n_pad // tm,),
        in_specs=[pl.BlockSpec((tm, n_pad), lambda i: (i, 0)),
                  pl.BlockSpec((n_pad, f_in), lambda i: (0, 0)),
                  pl.BlockSpec((f_in, h1), lambda i: (0, 0))],
        out_specs=pl.BlockSpec((tm, h1), lambda i: (i, 0)),
        compiler_params=enc_params,
    )(adjp, xp, w1b)

    z = pl.pallas_call(
        functools.partial(_gcn2_reparam_kernel, h2=h2),
        out_shape=jax.ShapeDtypeStruct((n_pad, h2), _BF16),
        grid=(n_pad // tm,),
        in_specs=[pl.BlockSpec((tm, n_pad), lambda i: (i, 0)),
                  pl.BlockSpec((n_pad, h1), lambda i: (0, 0)),
                  pl.BlockSpec((h1, 2 * h2), lambda i: (0, 0)),
                  pl.BlockSpec((tm, h2), lambda i: (i, 0))],
        out_specs=pl.BlockSpec((tm, h2), lambda i: (i, 0)),
        compiler_params=enc_params,
    )(adjp, hidden, wcb, noisep)

    # Decoder operands: pad the feature dim to a full 128-lane vreg (zero columns
    # leave z @ z.T unchanged) and pre-transpose the RHS once in the wrapper.
    hp = ((h2 + 127) // 128) * 128
    zp = jnp.pad(z, ((0, 0), (0, hp - h2)))
    zt = zp.T

    tile = next(t for t in (1024, 512, 256) if n_pad % t == 0)
    grid = (n_pad // tile, n_pad // tile)
    dec_cost = pl.CostEstimate(
        flops=2 * n_pad * n_pad * hp,
        transcendentals=n_pad * n_pad,
        bytes_accessed=2 * (n_pad * n_pad + 2 * n_pad * hp))
    # TODO(synk): exploit symmetry of z @ z.T (compute only i <= j tiles and
    # mirror-write the transposed tile via manual DMA) to halve MXU + writeback.
    a_pred = pl.pallas_call(
        _decoder_kernel,
        out_shape=jax.ShapeDtypeStruct((n_pad, n_pad), _BF16),
        grid=grid,
        in_specs=[pl.BlockSpec((tile, hp), lambda i, j: (i, 0)),
                  pl.BlockSpec((hp, tile), lambda i, j: (0, j))],
        out_specs=pl.BlockSpec((tile, tile), lambda i, j: (i, j)),
        compiler_params=pltpu.CompilerParams(
            dimension_semantics=("parallel", "parallel")),
        cost_estimate=dec_cost,
    )(zp, zt)
    return a_pred[:n, :n]


def vgae_forward(x, adj, w1, w_mu, w_sigma, noise):
    """VGAE forward pass. Returns A_pred = sigmoid(z @ z.T) in bfloat16."""
    n = x.shape[0]
    h2 = w_mu.shape[1]

    # Fuse the two projection weights -> one hidden @ W_cat, one adj propagation.
    w_cat = jnp.concatenate([w_mu, w_sigma], axis=1)

    xb = x.astype(_BF16)
    adjb = adj.astype(_BF16)
    w1b = w1.astype(_BF16)
    wcb = w_cat.astype(_BF16)
    noise = noise.astype(_F32)

    if n <= 512:
        return _forward_fused_small(xb, adjb, w1b, wcb, noise, h2)
    return _forward_tiled(xb, adjb, w1b, wcb, noise, h2)


# ---------------------------------------------------------------------------
# References
# ---------------------------------------------------------------------------
def vgae_reference(x, adj, w1, w_mu, w_sigma, noise):
    """Pure-f32 module semantics."""
    hidden = jnp.maximum(adj @ (x @ w1), 0.0)
    z = adj @ (hidden @ w_mu) + jnp.exp(adj @ (hidden @ w_sigma)) * noise
    return jax.nn.sigmoid(z @ z.T)


def vgae_reference_bf16(x, adj, w1, w_mu, w_sigma, noise):
    """Same math with the kernel's bf16-operand / f32-accumulation casts."""
    dot = lambda a, b: jnp.dot(a.astype(_BF16), b.astype(_BF16),
                               preferred_element_type=_F32)
    wcat = jnp.concatenate([w_mu, w_sigma], axis=1)
    h2 = w_mu.shape[1]
    hidden = jnp.maximum(dot(adj, dot(x, w1)), 0.0)
    zcat = dot(adj, dot(hidden, wcat))
    z = zcat[:, :h2] + jnp.exp(zcat[:, h2:]) * noise
    return jax.nn.sigmoid(dot(z, z.T))


if __name__ == "__main__":
    key = jax.random.PRNGKey(0)
    f_in, h1, h2 = 64, 32, 16          # n_feats, n_hid1, n_hid2

    def glorot(k, fi, fo):
        lim = jnp.sqrt(6.0 / (fi + fo))
        return jax.random.uniform(k, (fi, fo), _F32, -lim, lim)

    for n in (128, 600):               # 128 -> fused single-call path; 600 -> tiled
        k_x, k_adj, k_w1, k_wmu, k_wsig, k_noise = jax.random.split(
            jax.random.fold_in(key, n), 6)

        x = jax.random.normal(k_x, (n, f_in), _F32)

        # Deterministic symmetric-normalized adjacency A_hat = D^-1/2 (A+I) D^-1/2.
        a_raw = (jax.random.uniform(k_adj, (n, n)) < 0.05).astype(_F32)
        a_sym = jnp.maximum(a_raw, a_raw.T) + jnp.eye(n, dtype=_F32)
        dinv = 1.0 / jnp.sqrt(a_sym.sum(axis=1))
        adj = a_sym * dinv[:, None] * dinv[None, :]

        w1 = glorot(k_w1, f_in, h1)
        w_mu = glorot(k_wmu, h1, h2)
        w_sig = glorot(k_wsig, h1, h2)
        # torch.randn analogue for the reparameterization trick, passed in.
        noise = jax.random.normal(k_noise, (n, h2), _F32)

        a_pred = jax.block_until_ready(
            vgae_forward(x, adj, w1, w_mu, w_sig, noise))
        assert a_pred.shape == (n, n)
        assert a_pred.dtype == _BF16

        a_pred32 = a_pred.astype(_F32)
        ref_bf = vgae_reference_bf16(x, adj, w1, w_mu, w_sig, noise)
        ref_32 = vgae_reference(x, adj, w1, w_mu, w_sig, noise)

        # Tight check vs. the same bf16-operand math; loose check vs. pure-f32
        # module semantics (bf16 MXU inputs shift sigmoid outputs by O(1e-2)).
        assert float(jnp.max(jnp.abs(a_pred32 - ref_bf))) < 2e-2
        assert float(jnp.max(jnp.abs(a_pred32 - ref_32))) < 1e-1
        assert float(jnp.mean(jnp.abs(a_pred32 - ref_32))) < 5e-3

    print("KERNEL_OK")
</pallas_src>

<mosaic_0001>
module attributes {stable_mosaic.version = 11 : i64} {
  func.func @_fused_small_kernel(%arg0: memref<128x64xbf16, #tpu.memory_space<vmem>>, %arg1: memref<128x128xbf16, #tpu.memory_space<vmem>>, %arg2: memref<64x32xbf16, #tpu.memory_space<vmem>>, %arg3: memref<32x32xbf16, #tpu.memory_space<vmem>>, %arg4: memref<128x16xf32, #tpu.memory_space<vmem>>, %arg5: memref<128x128xbf16, #tpu.memory_space<vmem>>) attributes {dimension_semantics = [], scalar_prefetch = 0 : i64, scratch_operands = 0 : i64, tpu.core_type = #tpu.core_type<tc>} {
    %c0 = arith.constant 0 : index
    %c0_0 = arith.constant 0 : index
    %0 = vector.load %arg1[%c0, %c0_0] : memref<128x128xbf16, #tpu.memory_space<vmem>>, vector<128x128xbf16>
    %c0_1 = arith.constant 0 : index
    %c0_2 = arith.constant 0 : index
    %1 = vector.load %arg0[%c0_1, %c0_2] : memref<128x64xbf16, #tpu.memory_space<vmem>>, vector<128x64xbf16>
    %c0_3 = arith.constant 0 : index
    %c0_4 = arith.constant 0 : index
    %2 = vector.load %arg2[%c0_3, %c0_4] : memref<64x32xbf16, #tpu.memory_space<vmem>>, vector<64x32xbf16>
    %cst = arith.constant dense<0.000000e+00> : vector<128x32xf32>
    %3 = tpu.matmul %1, %2, %cst {dimension_numbers = #tpu.dot_dimension_numbers<[1], [0], [0], [1], [0, 0, 1, 1], [], []>} : vector<128x64xbf16>, vector<64x32xbf16>, vector<128x32xf32> -> vector<128x32xf32>
    %4 = arith.truncf %3 : vector<128x32xf32> to vector<128x32xbf16>
    %cst_5 = arith.constant dense<0.000000e+00> : vector<128x32xf32>
    %5 = tpu.matmul %0, %4, %cst_5 {dimension_numbers = #tpu.dot_dimension_numbers<[1], [0], [0], [1], [0, 0, 1, 1], [], []>} : vector<128x128xbf16>, vector<128x32xbf16>, vector<128x32xf32> -> vector<128x32xf32>
    %cst_6 = arith.constant 0.000000e+00 : f32
    %6 = vector.broadcast %cst_6 : f32 to vector<128x32xf32>
    %7 = arith.maximumf %5, %6 : vector<128x32xf32>
    %8 = arith.truncf %7 : vector<128x32xf32> to vector<128x32xbf16>
    %c0_7 = arith.constant 0 : index
    %c0_8 = arith.constant 0 : index
    %9 = vector.load %arg3[%c0_7, %c0_8] : memref<32x32xbf16, #tpu.memory_space<vmem>>, vector<32x32xbf16>
    %cst_9 = arith.constant dense<0.000000e+00> : vector<128x32xf32>
    %10 = tpu.matmul %8, %9, %cst_9 {dimension_numbers = #tpu.dot_dimension_numbers<[1], [0], [0], [1], [0, 0, 1, 1], [], []>} : vector<128x32xbf16>, vector<32x32xbf16>, vector<128x32xf32> -> vector<128x32xf32>
    %11 = arith.truncf %10 : vector<128x32xf32> to vector<128x32xbf16>
    %cst_10 = arith.constant dense<0.000000e+00> : vector<128x32xf32>
    %12 = tpu.matmul %0, %11, %cst_10 {dimension_numbers = #tpu.dot_dimension_numbers<[1], [0], [0], [1], [0, 0, 1, 1], [], []>} : vector<128x128xbf16>, vector<128x32xbf16>, vector<128x32xf32> -> vector<128x32xf32>
    %13 = vector.extract_strided_slice %12 {offsets = [0, 0], sizes = [128, 16], strides = [1, 1]} : vector<128x32xf32> to vector<128x16xf32>
    %14 = vector.extract_strided_slice %12 {offsets = [0, 16], sizes = [128, 16], strides = [1, 1]} : vector<128x32xf32> to vector<128x16xf32>
    %15 = math.exp %14 : vector<128x16xf32>
    %c0_11 = arith.constant 0 : index
    %c0_12 = arith.constant 0 : index
    %16 = vector.load %arg4[%c0_11, %c0_12] : memref<128x16xf32, #tpu.memory_space<vmem>>, vector<128x16xf32>
    %17 = arith.mulf %15, %16 : vector<128x16xf32>
    %18 = arith.addf %13, %17 : vector<128x16xf32>
    %19 = arith.truncf %18 : vector<128x16xf32> to vector<128x16xbf16>
    %cst_13 = arith.constant dense<0.000000e+00> : vector<128x128xf32>
    %20 = tpu.matmul %19, %19, %cst_13 {dimension_numbers = #tpu.dot_dimension_numbers<[1], [1], [0], [0], [0, 0, 1, 0], [], []>} : vector<128x16xbf16>, vector<128x16xbf16>, vector<128x128xf32> -> vector<128x128xf32>
    %21 = arith.negf %20 : vector<128x128xf32>
    %22 = math.exp %21 : vector<128x128xf32>
    %cst_14 = arith.constant 1.000000e+00 : f32
    %23 = vector.broadcast %cst_14 : f32 to vector<128x128xf32>
    %24 = arith.addf %23, %22 : vector<128x128xf32>
    %25 = arith.divf %23, %24 : vector<128x128xf32>
    %26 = arith.truncf %25 : vector<128x128xf32> to vector<128x128xbf16>
    %c0_15 = arith.constant 0 : index
    %c0_16 = arith.constant 0 : index
    %27 = vector.load %arg5[%c0_15, %c0_16] : memref<128x128xbf16, #tpu.memory_space<vmem>>, vector<128x128xbf16>
    tpu.vector_store %arg5[%c0_15, %c0_16], %26 {strides = array<i32>} : memref<128x128xbf16, #tpu.memory_space<vmem>>, vector<128x128xbf16>,
    return
  }
}

</mosaic_0001>

<bundles_post_ra>
// kernel: tpu_custom_call.1
= control target key start
LH: loop header
LB: loop body
LE: loop exit
PB: predicated region body
PF: predicated region fallthrough
CT: control target
= control target key end

     0   :  { %s1883_s0 = inlined_call_operand.vmem [shape: bf16[128,64], index: 0, kind: input, shape index: {}]   ;;  %s1884_s1 = inlined_call_operand.vmem [shape: bf16[128,128], index: 1, kind: input, shape index: {}]   ;;  %s1885_s2 = inlined_call_operand.vmem [shape: bf16[64,32], index: 2, kind: input, shape index: {}]   ;;  %s1886_s3 = inlined_call_operand.vmem [shape: bf16[32,32], index: 3, kind: input, shape index: {}]   ;;  %s1887_s4 = inlined_call_operand.vmem [shape: f32[128,16], index: 4, kind: input, shape index: {}]   ;;  %s1888_s5 = inlined_call_operand.hbm [shape: bf16[128,128], index: 5, kind: output, shape index: {}]  }
   0x1   :  { %v1267_v0 = vld [vmem:[%s1885_s2 + $0x18] sm:$0xff]  ;;  %v1266_v1 = vld [vmem:[%s1885_s2 + $0x10] sm:$0xff] }
   0x2   :  { %155 = vmatpush.bf16.msra.mxu0 %v1267_v0 }
   0x3   :  { %10 = vsyncpa [#allocation3], 0  ;;  %v1265_v2 = vld [vmem:[%s1885_s2 + $0x8] sm:$0xff]  ;;  %v1264_v3 = vld [vmem:[%s1885_s2] sm:$0xff]  ;;  %vm126_vm0 = vcmask 523264   ;;  %vm345_vm1 = vcmask 261120  }
   0x4   :  { %v1256_v4 = vld [vmem:[%s1883_s0] sm:$0xff]  ;;  %v1257_v5 = vld [vmem:[%s1883_s0 + $0x8] sm:$0xff]  ;;  %v1258_v6 = vld [vmem:[%s1883_s0 + $0x10] sm:$0xff]  ;;  %s1456_s9 = smov 16   ;;  %vm692_vm2 = vcmask 130048   ;;  %s1108_s15 = sshll.u32 %s1888_s5, 4  ;;  %s1109_s15 = int_to_ptr.hbm [resolvable:$true] %s1108_s15 }
   0x5   :  { %v1259_v7 = vld [vmem:[%s1883_s0 + $0x18] sm:$0xff]  ;;  %v1260_v8 = vld [vmem:[%s1883_s0 + $0x20] sm:$0xff]  ;;  %v1261_v9 = vld [vmem:[%s1883_s0 + $0x28] sm:$0xff]  ;;  %s1460_s16 = smov 4  }
   0x6   :  { %156 = vmatpush.bf16.msra.mxu0 %v1266_v1  ;;  %v1262_v10 = vld [vmem:[%s1883_s0 + $0x30] sm:$0xff]  ;;  %v1263_v11 = vld [vmem:[%s1883_s0 + $0x38] sm:$0xff]  ;;  %v1530_v36 = vld [vmem:[%s1884_s1] sm:$0xff]  ;;  %s1459_s0 = smov 64  }
   0x7   :  { %v1536_v37 = vld [vmem:[%s1884_s1 + $0x8] sm:$0xff]  ;;  %v1542_v38 = vld [vmem:[%s1884_s1 + $0x10] sm:$0xff]  ;;  %v1548_v39 = vld [vmem:[%s1884_s1 + $0x18] sm:$0xff] }
   0x8   :  { %v1554_v40 = vld [vmem:[%s1884_s1 + $0x20] sm:$0xff]  ;;  %v1560_v41 = vld [vmem:[%s1884_s1 + $0x28] sm:$0xff]  ;;  %v1569_v43 = vld [vmem:[%s1884_s1 + $0x30] sm:$0xff] }
   0x9   :  { %v1269_v42 = vld [vmem:[%s1886_s3 + $0x8] sm:$0xff]  ;;  %v1268_v44 = vld [vmem:[%s1886_s3] sm:$0xff]  ;;  %v1578_v45 = vld [vmem:[%s1884_s1 + $0x38] sm:$0xff]  ;;  %s1457_s1 = smov 112  }
   0xa   :  { %157 = vmatpush.bf16.msra.mxu0 %v1265_v2  ;;  %1318 = vmatpush.bf16.msra.mxu2 %v1269_v42 }
   0xe   :  { %158 = vmatpush.bf16.msra.mxu0 %v1264_v3  ;;  %1320 = vmatpush.bf16.msra.mxu2 %v1268_v44 }
  0x11   :  { %1168 = vmatmul.msk.bf16.vlgmr.msra.gmra.mxu0 %vm126_vm0, %v1256_v4 }
  0x12   :  { %376 = vmatpush.bf16.msrb.mxu0 %v1269_v42 }
  0x16   :  { %377 = vmatpush.bf16.msrb.mxu0 %v1268_v44 }
  0x21   :  { %1169 = vmatmul.msk.bf16.gmra.mxu0 %vm126_vm0, %v1257_v5 }
  0x31   :  { %1170 = vmatmul.msk.bf16.gmra.mxu0 %vm126_vm0, %v1258_v6 }
  0x41   :  { %1171 = vmatmul.msk.bf16.gmra.mxu0 %vm126_vm0, %v1259_v7 }
  0x51   :  { %1172 = vmatmul.msk.bf16.gmra.mxu0 %vm126_vm0, %v1260_v8 }
  0x61   :  { %1173 = vmatmul.msk.bf16.gmra.mxu0 %vm126_vm0, %v1261_v9 }
  0x71   :  { %1174 = vmatmul.msk.bf16.gmra.mxu0 %vm126_vm0, %v1262_v10 }
  0x81   :  { %1175 = vmatmul.msk.bf16.gmra.mxu0 %vm126_vm0, %v1263_v11 }
  0x8e   :  { %v160_v12 = vpop.f32.mrf.mxu0 }
  0x96   :  { %v162_v13 = vpop.f32.mrf.mxu0 }
  0x97   :  { %v200_v14 = vpack.c.bf16 %v162_v13, %v160_v12 }
  0x9e   :  { %v165_v15 = vpop.f32.mrf.mxu0 }
  0xa6   :  { %v167_v16 = vpop.f32.mrf.mxu0 }
  0xa7   :  { %v201_v17 = vpack.c.bf16 %v167_v16, %v165_v15 }
  0xae   :  { %v170_v18 = vpop.f32.mrf.mxu0 }
  0xb6   :  { %v172_v19 = vpop.f32.mrf.mxu0 }
  0xb7   :  { %v202_v20 = vpack.c.bf16 %v172_v19, %v170_v18 }
  0xbe   :  { %v175_v21 = vpop.f32.mrf.mxu0 }
  0xc6   :  { %v177_v22 = vpop.f32.mrf.mxu0 }
  0xc7   :  { %v203_v23 = vpack.c.bf16 %v177_v22, %v175_v21 }
  0xce   :  { %v180_v24 = vpop.f32.mrf.mxu0 }
  0xd6   :  { %v182_v25 = vpop.f32.mrf.mxu0 }
  0xd7   :  { %v204_v35 = vpack.c.bf16 %v182_v25, %v180_v24 }
  0xde   :  { %v185_v26 = vpop.f32.mrf.mxu0 }
  0xe6   :  { %v187_v27 = vpop.f32.mrf.mxu0 }
  0xe7   :  { %v205_v34 = vpack.c.bf16 %v187_v27, %v185_v26 }
  0xee   :  { %v190_v28 = vpop.f32.mrf.mxu0 }
  0xf6   :  { %v192_v29 = vpop.f32.mrf.mxu0 }
  0xf7   :  { %v206_v33 = vpack.c.bf16 %v192_v29, %v190_v28 }
  0xfe   :  { %v195_v30 = vpop.f32.mrf.mxu0 }
 0x106   :  { %v197_v31 = vpop.f32.mrf.mxu0 }
 0x107   :  { %v207_v32 = vpack.c.bf16 %v197_v31, %v195_v30 }
 0x109   :  { %256 = vmatpush.bf16.msra.mxu1 %v207_v32 }
 0x10d   :  { %257 = vmatpush.bf16.msra.mxu1 %v206_v33 }
 0x111   :  { %258 = vmatpush.bf16.msra.mxu1 %v205_v34 }
 0x115   :  { %259 = vmatpush.bf16.msra.mxu1 %v204_v35 }
 0x119   :  { %260 = vmatpush.bf16.msra.mxu1 %v203_v23 }
 0x11d   :  { %261 = vmatpush.bf16.msra.mxu1 %v202_v20 }
 0x121   :  { %262 = vmatpush.bf16.msra.mxu1 %v201_v17 }
 0x125   :  { %263 = vmatpush.bf16.msra.mxu1 %v200_v14 }
 0x128   :  { %264 = vmatmul.bf16.vlgmr.msra.gmra.mxu1 %v1530_v36 }
 0x129   :  { %1317 = vmatpush.bf16.msrb.mxu1 %v1269_v42 }
 0x12d   :  { %1319 = vmatpush.bf16.msrb.mxu1 %v1268_v44 }
 0x138   :  { %269 = vmatmul.bf16.gmra.mxu1 %v1536_v37 }
 0x148   :  { %274 = vmatmul.bf16.gmra.mxu1 %v1542_v38 }
 0x158   :  { %279 = vmatmul.bf16.gmra.mxu1 %v1548_v39 }
 0x168   :  { %284 = vmatmul.bf16.gmra.mxu1 %v1554_v40 }
 0x178   :  { %289 = vmatmul.bf16.gmra.mxu1 %v1560_v41 }
 0x188   :  { %294 = vmatmul.bf16.gmra.mxu1 %v1569_v43 }
 0x198   :  { %299 = vmatmul.bf16.gmra.mxu1 %v1578_v45 }
 0x1a5   :  { %v265_v46 = vpop.f32.mrf.mxu1 }
 0x1a6   :  { %v305_v48 = vmax.f32 %v265_v46, 0.0 }
 0x1ad   :  { %v267_v47 = vpop.f32.mrf.mxu1 }
 0x1ae   :  { %v306_v49 = vmax.f32 %v267_v47, 0.0 }
 0x1b0   :  { %v321_v50 = vpack.c.bf16 %v306_v49, %v305_v48 }
 0x1b2   :  { %1216 = vmatmul.msk.bf16.vlgmr.msrb.gmra.mxu0 %vm345_vm1, %v321_v50 }
 0x1b5   :  { %v270_v51 = vpop.f32.mrf.mxu1 }
 0x1b6   :  { %v307_v53 = vmax.f32 %v270_v51, 0.0  ;;  %v522_v51 = vld [vmem:[%s1887_s4 + $0x70] sm:$0xff] }
 0x1b7   :  { %568 = vrot.lane.b32.xlu0 %v522_v51, %s1456_s9 }
 0x1bd   :  { %v272_v52 = vpop.f32.mrf.mxu1 }
 0x1be   :  { %v308_v54 = vmax.f32 %v272_v52, 0.0 }
 0x1c0   :  { %v322_v55 = vpack.c.bf16 %v308_v54, %v307_v53  ;;  %v523_v53 = vld [vmem:[%s1887_s4 + $0x78] sm:$0xff] }
 0x1c1   :  { %570 = vrot.lane.b32.xlu0 %v523_v53, %s1456_s9 }
 0x1c2   :  { %1217 = vmatmul.msk.bf16.gmra.mxu0 %vm345_vm1, %v322_v55 }
 0x1c5   :  { %v275_v56 = vpop.f32.mrf.mxu1 }
 0x1c6   :  { %v309_v58 = vmax.f32 %v275_v56, 0.0  ;;  %v520_v56 = vld [vmem:[%s1887_s4 + $0x60] sm:$0xff] }
 0x1c7   :  { %564 = vrot.lane.b32.xlu1 %v520_v56, %s1456_s9 }
 0x1cd   :  { %v277_v57 = vpop.f32.mrf.mxu1 }
 0x1ce   :  { %v310_v59 = vmax.f32 %v277_v57, 0.0  ;;  %v518_v57 = vld [vmem:[%s1887_s4 + $0x50] sm:$0xff] }
 0x1cf   :  { %560 = vrot.lane.b32.xlu2 %v518_v57, %s1456_s9 }
 0x1d0   :  { %v323_v60 = vpack.c.bf16 %v310_v59, %v309_v58  ;;  %v516_v58 = vld [vmem:[%s1887_s4 + $0x40] sm:$0xff]  ;;  %v519_v59 = vld [vmem:[%s1887_s4 + $0x58] sm:$0xff] }
 0x1d1   :  { %556 = vrot.lane.b32.xlu0 %v516_v58, %s1456_s9 }
 0x1d2   :  { %1218 = vmatmul.msk.bf16.gmra.mxu0 %vm345_vm1, %v323_v60  ;;  %v515_v60 = vld [vmem:[%s1887_s4 + $0x38] sm:$0xff] }
 0x1d5   :  { %v280_v61 = vpop.f32.mrf.mxu1 }
 0x1d6   :  { %v311_v63 = vmax.f32 %v280_v61, 0.0  ;;  %v517_v61 = vld [vmem:[%s1887_s4 + $0x48] sm:$0xff] }
 0x1d7   :  { %562 = vrot.lane.b32.xlu2 %v519_v59, %s1456_s9 }
 0x1d9   :  { %554 = vrot.lane.b32.xlu0 %v515_v60, %s1456_s9 }
 0x1dd   :  { %v282_v62 = vpop.f32.mrf.mxu1 }
 0x1de   :  { %v312_v0 = vmax.f32 %v282_v62, 0.0  ;;  %v514_v62 = vld [vmem:[%s1887_s4 + $0x30] sm:$0xff] }
 0x1df   :  { %552 = vrot.lane.b32.xlu2 %v514_v62, %s1456_s9 }
 0x1e0   :  { %v324_v1 = vpack.c.bf16 %v312_v0, %v311_v63  ;;  %v511_v63 = vld [vmem:[%s1887_s4 + $0x18] sm:$0xff]  ;;  %v512_v0 = vld [vmem:[%s1887_s4 + $0x20] sm:$0xff] }
 0x1e1   :  { %546 = vrot.lane.b32.xlu0 %v511_v63, %s1456_s9 }
 0x1e2   :  { %1219 = vmatmul.msk.bf16.vlgmr.msrb.gmra.mxu1 %vm345_vm1, %v324_v1  ;;  %v510_v1 = vld [vmem:[%s1887_s4 + $0x10] sm:$0xff] }
 0x1e5   :  { %v285_v2 = vpop.f32.mrf.mxu1 }
 0x1e6   :  { %v313_v4 = vmax.f32 %v285_v2, 0.0 }
 0x1ed   :  { %v287_v3 = vpop.f32.mrf.mxu1 }
 0x1ee   :  { %v314_v5 = vmax.f32 %v287_v3, 0.0 }
 0x1f0   :  { %v325_v6 = vpack.c.bf16 %v314_v5, %v313_v4 }
 0x1f2   :  { %1220 = vmatmul.msk.bf16.vlgmr.msra.gmra.mxu2 %vm345_vm1, %v325_v6 }
 0x1f5   :  { %v290_v7 = vpop.f32.mrf.mxu1 }
 0x1f6   :  { %v315_v9 = vmax.f32 %v290_v7, 0.0 }
 0x1fd   :  { %v292_v8 = vpop.f32.mrf.mxu1 }
 0x1fe   :  { %v316_v10 = vmax.f32 %v292_v8, 0.0 }
 0x200   :  { %v326_v11 = vpack.c.bf16 %v316_v10, %v315_v9 }
 0x202   :  { %1221 = vmatmul.msk.bf16.gmra.mxu2 %vm345_vm1, %v326_v11 }
 0x205   :  { %v295_v12 = vpop.f32.mrf.mxu1 }
 0x206   :  { %v317_v14 = vmax.f32 %v295_v12, 0.0 }
 0x20d   :  { %v297_v13 = vpop.f32.mrf.mxu1 }
 0x20e   :  { %v318_v15 = vmax.f32 %v297_v13, 0.0 }
 0x210   :  { %v327_v16 = vpack.c.bf16 %v318_v15, %v317_v14 }
 0x212   :  { %1222 = vmatmul.msk.bf16.gmra.mxu2 %vm345_vm1, %v327_v16 }
 0x215   :  { %v300_v17 = vpop.f32.mrf.mxu1 }
 0x216   :  { %v319_v19 = vmax.f32 %v300_v17, 0.0 }
 0x21d   :  { %v302_v18 = vpop.f32.mrf.mxu1 }
 0x21e   :  { %v320_v20 = vmax.f32 %v302_v18, 0.0 }
 0x220   :  { %v328_v21 = vpack.c.bf16 %v320_v20, %v319_v19 }
 0x222   :  { %1223 = vmatmul.msk.bf16.gmra.mxu2 %vm345_vm1, %v328_v21 }
 0x229   :  { %v569_v9 = vpop.permute.xlu0 %568 }
 0x22f   :  { %v379_v25 = vpop.f32.mrf.mxu0 }
 0x233   :  { %v571_v16 = vpop.permute.xlu0 %570 }
 0x237   :  { %v381_v28 = vpop.f32.mrf.mxu0 }
 0x238   :  { %v419_v55 = vpack.c.bf16 %v381_v28, %v379_v25 }
 0x239   :  { %v565_v10 = vpop.permute.xlu1 %564 }
 0x23f   :  { %v384_v30 = vpop.f32.mrf.mxu0 }
 0x243   :  { %v557_v28 = vpop.permute.xlu0 %556 }
 0x247   :  { %v386_v32 = vpop.f32.mrf.mxu0 }
 0x248   :  { %v420_v54 = vpack.c.bf16 %v386_v32, %v384_v30 }
 0x24f   :  { %v389_v44 = vpop.f32.mrf.mxu0 }
 0x257   :  { %v391_v50 = vpop.f32.mrf.mxu0 }
 0x258   :  { %v421_v52 = vpack.c.bf16 %v391_v50, %v389_v44 }
 0x25f   :  { %v394_v35 = vpop.f32.mrf.mxu1 }
 0x267   :  { %v396_v48 = vpop.f32.mrf.mxu1 }
 0x268   :  { %v422_v49 = vpack.c.bf16 %v396_v48, %v394_v35  ;;  %v508_v35 = vld [vmem:[%s1887_s4] sm:$0xff]  ;;  %v555_v48 = vpop.permute.xlu0 %554 }
 0x275   :  { %v399_v22 = vpop.f32.mrf.mxu2 }
 0x27d   :  { %v401_v23 = vpop.f32.mrf.mxu2 }
 0x27e   :  { %v423_v47 = vpack.c.bf16 %v401_v23, %v399_v22 }
 0x285   :  { %v404_v24 = vpop.f32.mrf.mxu2 }
 0x28d   :  { %v406_v26 = vpop.f32.mrf.mxu2 }
 0x28e   :  { %v424_v46 = vpack.c.bf16 %v406_v26, %v404_v24  ;;  %v561_v24 = vpop.permute.xlu2 %560 }
 0x295   :  { %v409_v27 = vpop.f32.mrf.mxu2 }
 0x29d   :  { %v411_v29 = vpop.f32.mrf.mxu2 }
 0x29e   :  { %v425_v42 = vpack.c.bf16 %v411_v29, %v409_v27 }
 0x2a5   :  { %v414_v31 = vpop.f32.mrf.mxu2 }
 0x2ad   :  { %v416_v33 = vpop.f32.mrf.mxu2 }
 0x2ae   :  { %v426_v34 = vpack.c.bf16 %v416_v33, %v414_v31 }
 0x2b0   :  { %427 = vmatpush.bf16.msra.mxu3 %v426_v34 }
 0x2b4   :  { %428 = vmatpush.bf16.msra.mxu3 %v425_v42 }
 0x2b8   :  { %429 = vmatpush.bf16.msra.mxu3 %v424_v46 }
 0x2bc   :  { %430 = vmatpush.bf16.msra.mxu3 %v423_v47  ;;  %v563_v47 = vpop.permute.xlu2 %562 }
 0x2c0   :  { %431 = vmatpush.bf16.msra.mxu3 %v422_v49 }
 0x2c4   :  { %432 = vmatpush.bf16.msra.mxu3 %v421_v52  ;;  %v553_v60 = vpop.permute.xlu2 %552 }
 0x2c8   :  { %433 = vmatpush.bf16.msra.mxu3 %v420_v54 }
 0x2cc   :  { %434 = vmatpush.bf16.msra.mxu3 %v419_v55 }
 0x2cf   :  { %435 = vmatmul.bf16.vlgmr.msra.gmra.mxu3 %v1530_v36  ;;  %v521_v36 = vld [vmem:[%s1887_s4 + $0x68] sm:$0xff] }
 0x2d0   :  { %566 = vrot.lane.b32.xlu1 %v521_v36, %s1456_s9 }
 0x2d8   :  { %558 = vrot.lane.b32.xlu1 %v517_v61, %s1456_s9  ;;  %v547_v61 = vpop.permute.xlu0 %546 }
 0x2df   :  { %440 = vmatmul.bf16.gmra.mxu3 %v1536_v37  ;;  %v513_v37 = vld [vmem:[%s1887_s4 + $0x28] sm:$0xff] }
 0x2e0   :  { %550 = vrot.lane.b32.xlu2 %v513_v37, %s1456_s9  ;;  %548 = vrot.lane.b32.xlu1 %v512_v0, %s1456_s9  ;;  %v509_v37 = vld [vmem:[%s1887_s4 + $0x8] sm:$0xff]  ;;  %s1458_s4 = smov [#allocation2]  }
 0x2e8   :  { %544 = vrot.lane.b32.xlu2 %v510_v1, %s1456_s9 }
 0x2ef   :  { %445 = vmatmul.bf16.gmra.mxu3 %v1542_v38 }
 0x2ff   :  { %450 = vmatmul.bf16.gmra.mxu3 %v1548_v39 }
 0x30f   :  { %455 = vmatmul.bf16.gmra.mxu3 %v1554_v40 }
 0x31f   :  { %460 = vmatmul.bf16.gmra.mxu3 %v1560_v41 }
 0x32f   :  { %465 = vmatmul.bf16.gmra.mxu3 %v1569_v43 }
 0x33f   :  { %470 = vmatmul.bf16.gmra.mxu3 %v1578_v45 }
 0x342   :  { %v567_v17 = vpop.permute.xlu1 %566 }
 0x34a   :  { %v559_v30 = vpop.permute.xlu1 %558 }
 0x352   :  { %v1653_v2 = vpop.f32.mrf.mxu3  ;;  %v549_v52 = vpop.permute.xlu1 %548 }
 0x35a   :  { %v1655_v3 = vpop.f32.mrf.mxu3 }
 0x362   :  { %v1657_v38 = vpop.f32.mrf.mxu3 }
 0x36a   :  { %v1659_v4 = vpop.f32.mrf.mxu3 }
 0x36b   :  { %v482_v46 = vmul.f32 1.442695, %v1659_v4 }
 0x372   :  { %v1661_v5 = vpop.f32.mrf.mxu3 }
 0x373   :  { %v484_v29 = vmul.f32 1.442695, %v1661_v5 }
 0x37a   :  { %v1663_v6 = vpop.f32.mrf.mxu3 }
 0x37b   :  { %v486_v57 = vmul.f32 1.442695, %v1663_v6 }
 0x382   :  { %v1665_v39 = vpop.f32.mrf.mxu3 }
 0x383   :  { %v488_v49 = vmul.f32 1.442695, %v1665_v39 }
 0x38a   :  { %v1667_v40 = vpop.f32.mrf.mxu3 }
 0x38b   :  { %v490_v0 = vmul.f32 1.442695, %v1667_v40 }
 0x392   :  { %v1669_v41 = vpop.f32.mrf.mxu3 }
 0x393   :  { %v492_v36 = vmul.f32 1.442695, %v1669_v41 }
 0x39a   :  { %v1671_v43 = vpop.f32.mrf.mxu3 }
 0x39b   :  { %v494_v20 = vmul.f32 1.442695, %v1671_v43 }
 0x3a2   :  { %v1673_v45 = vpop.f32.mrf.mxu3 }
 0x3a3   :  { %v496_v13 = vmul.f32 1.442695, %v1673_v45 }
 0x3aa   :  { %v1675_v7 = vpop.f32.mrf.mxu3 }
 0x3ab   :  { %v498_v31 = vmul.f32 1.442695, %v1675_v7 }
 0x3b2   :  { %v1677_v8 = vpop.f32.mrf.mxu3 }
 0x3b3   :  { %v500_v32 = vmul.f32 1.442695, %v1677_v8 }
 0x3ba   :  { %v1679_v11 = vpop.f32.mrf.mxu3 }
 0x3bb   :  { %v502_v12 = vmul.f32 1.442695, %v1679_v11 }
 0x3bd   :  { %1334 = vpow2.f32 %v502_v12 }
 0x3be   :  { %1336 = vpow2.f32 %v496_v13 }
 0x3c2   :  { %v1683_v14 = vpop.f32.mrf.mxu3 }
 0x3c3   :  { %v1335_v15 = vpop.eup %1334  ;;  %v504_v18 = vmul.f32 1.442695, %v1683_v14 }
 0x3c4   :  { %v601_v19 = vmul.f32 %v1335_v15, %v567_v17  ;;  %v1337_v21 = vpop.eup %1336  ;;  %v480_v15 = vmul.f32 1.442695, %v1657_v38 }
 0x3c5   :  { %1338 = vpow2.f32 %v504_v18  ;;  %v598_v26 = vmul.f32 %v1337_v21, %v561_v24  ;;  %v476_v21 = vmul.f32 1.442695, %v1653_v2 }
 0x3c6   :  { %646 = vrot.lane.b32.xlu2 %v601_v19, %s1457_s1  ;;  %1340 = vpow2.f32 %v494_v20 }
 0x3ca   :  { %v1688_v22 = vpop.f32.mrf.mxu3 }
 0x3cb   :  { %v1339_v23 = vpop.eup %1338  ;;  %v506_v25 = vmul.f32 1.442695, %v1688_v22 }
 0x3cc   :  { %v602_v27 = vmul.f32 %v1339_v23, %v569_v9  ;;  %v1341_v33 = vpop.eup %1340 }
 0x3cd   :  { %1342 = vpow2.f32 %v506_v25  ;;  %v597_v42 = vmul.f32 %v1341_v33, %v559_v30  ;;  %v478_v33 = vmul.f32 1.442695, %v1655_v3 }
 0x3ce   :  { %640 = vrot.lane.b32.xlu2 %v598_v26, %s1457_s1  ;;  %648 = vrot.lane.b32.xlu0 %v602_v27, %s1457_s1  ;;  %1344 = vpow2.f32 %v484_v29 }
 0x3cf   :  { %1346 = vpow2.f32 %v498_v31 }
 0x3d0   :  { %1348 = vpow2.f32 %v500_v32 }
 0x3d1   :  { %1350 = vpow2.f32 %v482_v46 }
 0x3d2   :  { %1352 = vpow2.f32 %v488_v49 }
 0x3d3   :  { %v1343_v34 = vpop.eup %1342  ;;  %1354 = vpow2.f32 %v486_v57 }
 0x3d4   :  { %v603_v44 = vmul.f32 %v1343_v34, %v571_v16  ;;  %v1345_v50 = vpop.eup %1344  ;;  %1356 = vpow2.f32 %v492_v36 }
 0x3d5   :  { %v1347_v51 = vpop.eup %1346  ;;  %v592_v54 = vmul.f32 %v1345_v50, %v549_v52  ;;  %1358 = vpow2.f32 %v490_v0 }
 0x3d6   :  { %638 = vrot.lane.b32.xlu2 %v597_v42, %s1457_s1  ;;  %540 = vrot.lane.b32.xlu0 %v508_v35, %s1456_s9  ;;  %v1349_v53 = vpop.eup %1348  ;;  %v599_v55 = vmul.f32 %v1347_v51, %v563_v47  ;;  %1360 = vpow2.f32 %v480_v15 }
 0x3d7   :  { %650 = vrot.lane.b32.xlu1 %v603_v44, %s1457_s1  ;;  %v600_v56 = vmul.f32 %v1349_v53, %v565_v10  ;;  %v1351_v58 = vpop.eup %1350  ;;  %v551_v10 = vpop.permute.xlu2 %550  ;;  %1362 = vpow2.f32 %v476_v21 }
 0x3d8   :  { %v1353_v59 = vpop.eup %1352  ;;  %v591_v62 = vmul.f32 %v1351_v58, %v547_v61  ;;  %1364 = vpow2.f32 %v478_v33 }
 0x3d9   :  { %v594_v63 = vmul.f32 %v1353_v59, %v553_v60  ;;  %v1355_v1 = vpop.eup %1354 }
 0x3da   :  { %v1357_v9 = vpop.eup %1356  ;;  %v593_v12 = vmul.f32 %v1355_v1, %v551_v10 }
 0x3db   :  { %v596_v13 = vmul.f32 %v1357_v9, %v557_v28  ;;  %v1359_v16 = vpop.eup %1358 }
 0x3dc   :  { %v595_v17 = vmul.f32 %v1359_v16, %v555_v48  ;;  %v1361_v18 = vpop.eup %1360 }
 0x3dd   :  { %v1363_v24 = vpop.eup %1362 }
 0x3de   :  { %628 = vrot.lane.b32.xlu2 %v592_v54, %s1457_s1  ;;  %642 = vrot.lane.b32.xlu0 %v599_v55, %s1457_s1  ;;  %v1365_v49 = vpop.eup %1364 }
 0x3df   :  { %644 = vrot.lane.b32.xlu1 %v600_v56, %s1457_s1  ;;  %v545_v19 = vpop.permute.xlu2 %544 }
 0x3e0   :  { %v590_v20 = vmul.f32 %v1361_v18, %v545_v19 }
 0x3e6   :  { %626 = vrot.lane.b32.xlu2 %v591_v62, %s1457_s1  ;;  %632 = vrot.lane.b32.xlu0 %v594_v63, %s1457_s1 }
 0x3e7   :  { %542 = vrot.lane.b32.xlu1 %v509_v37, %s1456_s9  ;;  %s1106_s9 = sshll.u32 %s1458_s4, 4  ;;  %s1107_s9 = int_to_ptr.vmem [resolvable:$true] %s1106_s9 }
 0x3ee   :  { %630 = vrot.lane.b32.xlu0 %v593_v12, %s1457_s1 }
 0x3ef   :  { %636 = vrot.lane.b32.xlu1 %v596_v13, %s1457_s1 }
 0x3f7   :  { %634 = vrot.lane.b32.xlu1 %v595_v17, %s1457_s1 }
 0x3ff   :  { %624 = vrot.lane.b32.xlu1 %v590_v20, %s1457_s1 }
 0x420   :  { %v647_v30 = vpop.permute.xlu2 %646 }
 0x421   :  { %v681_v35 = vadd.f32 %v647_v30, %v1679_v11 }
 0x428   :  { %v641_v44 = vpop.permute.xlu2 %640 }
 0x429   :  { %v678_v48 = vadd.f32 %v641_v44, %v1673_v45 }
 0x430   :  { %v639_v11 = vpop.permute.xlu2 %638 }
 0x438   :  { %v629_v59 = vpop.permute.xlu2 %628 }
 0x440   :  { %v649_v23 = vpop.permute.xlu0 %648  ;;  %v627_v0 = vpop.permute.xlu2 %626 }
 0x441   :  { %v682_v28 = vadd.f32 %v649_v23, %v1683_v14 }
 0x448   :  { %v541_v25 = vpop.permute.xlu0 %540 }
 0x449   :  { %v588_v26 = vmul.f32 %v1363_v24, %v541_v25  ;;  %v651_v27 = vpop.permute.xlu1 %650 }
 0x44a   :  { %v683_v29 = vadd.f32 %v651_v27, %v1688_v22 }
 0x44b   :  { %620 = vrot.lane.b32.xlu0 %v588_v26, %s1457_s1 }
 0x44c   :  { %v1725_v31 = vpack.c.bf16 %v683_v29, %v682_v28 }
 0x44e   :  { %v715_v32 = vsel %vm692_vm2, %v1725_v31, 0 }
 0x44f   :  { %717 = vmatpush.bf16.xpose.msrb.mxu2 %v715_v32  ;;  %1321 = vmatpush.bf16.xpose.msrb.mxu3 %v715_v32 }
 0x450   :  { %v643_v22 = vpop.permute.xlu0 %642 }
 0x451   :  { %v645_v34 = vpop.permute.xlu1 %644  ;;  %v679_v46 = vadd.f32 %v643_v22, %v1675_v7  ;;  %v677_v7 = vadd.f32 %v639_v11, %v1671_v43 }
 0x452   :  { %v680_v14 = vadd.f32 %v645_v34, %v1677_v8 }
 0x453   :  { %v689_v52 = vpack.c.bf16 %v679_v46, %v678_v48 }
 0x454   :  { %v690_v42 = vpack.c.bf16 %v681_v35, %v680_v14 }
 0x455   :  { %v709_v8 = vsel %vm692_vm2, %v689_v52, 0 }
 0x456   :  { %v712_v47 = vsel %vm692_vm2, %v690_v42, 0 }
 0x457   :  { %718 = vmatpush.bf16.xpose.msrb.mxu2 %v712_v47  ;;  %1322 = vmatpush.bf16.xpose.msrb.mxu3 %v712_v47 }
 0x458   :  { %v633_v53 = vpop.permute.xlu0 %632 }
 0x459   :  { %v543_v50 = vpop.permute.xlu1 %542  ;;  %v674_v58 = vadd.f32 %v633_v53, %v1665_v39 }
 0x45a   :  { %v589_v51 = vmul.f32 %v1365_v49, %v543_v50 }
 0x45c   :  { %622 = vrot.lane.b32.xlu1 %v589_v51, %s1457_s1 }
 0x45f   :  { %719 = vmatpush.bf16.xpose.msrb.mxu2 %v709_v8  ;;  %1323 = vmatpush.bf16.xpose.msrb.mxu3 %v709_v8 }
 0x460   :  { %v631_v60 = vpop.permute.xlu0 %630 }
 0x461   :  { %v637_v54 = vpop.permute.xlu1 %636  ;;  %v673_v62 = vadd.f32 %v631_v60, %v1663_v6 }
 0x462   :  { %v676_v55 = vadd.f32 %v637_v54, %v1669_v41  ;;  %v672_v41 = vadd.f32 %v629_v59, %v1661_v5 }
 0x464   :  { %v688_v56 = vpack.c.bf16 %v677_v7, %v676_v55  ;;  %v686_v43 = vpack.c.bf16 %v673_v62, %v672_v41 }
 0x466   :  { %v706_v45 = vsel %vm692_vm2, %v688_v56, 0  ;;  %v700_v39 = vsel %vm692_vm2, %v686_v43, 0 }
 0x467   :  { %720 = vmatpush.bf16.xpose.msrb.mxu2 %v706_v45  ;;  %1324 = vmatpush.bf16.xpose.msrb.mxu3 %v706_v45 }
 0x469   :  { %v635_v57 = vpop.permute.xlu1 %634 }
 0x46a   :  { %v675_v36 = vadd.f32 %v635_v57, %v1667_v40  ;;  %v671_v40 = vadd.f32 %v627_v0, %v1659_v4 }
 0x46c   :  { %v687_v61 = vpack.c.bf16 %v675_v36, %v674_v58 }
 0x46e   :  { %v703_v63 = vsel %vm692_vm2, %v687_v61, 0 }
 0x46f   :  { %721 = vmatpush.bf16.xpose.msrb.mxu2 %v703_v63  ;;  %1325 = vmatpush.bf16.xpose.msrb.mxu3 %v703_v63 }
 0x471   :  { %v625_v37 = vpop.permute.xlu1 %624 }
 0x472   :  { %v670_v1 = vadd.f32 %v625_v37, %v1657_v38 }
 0x474   :  { %v685_v9 = vpack.c.bf16 %v671_v40, %v670_v1 }
 0x476   :  { %v697_v6 = vsel %vm692_vm2, %v685_v9, 0 }
 0x477   :  { %722 = vmatpush.bf16.xpose.msrb.mxu2 %v700_v39  ;;  %1326 = vmatpush.bf16.xpose.msrb.mxu3 %v700_v39 }
 0x47f   :  { %723 = vmatpush.bf16.xpose.msrb.mxu2 %v697_v6  ;;  %1327 = vmatpush.bf16.xpose.msrb.mxu3 %v697_v6 }
 0x4bd   :  { %v621_v10 = vpop.permute.xlu0 %620 }
 0x4be   :  { %v668_v5 = vadd.f32 %v621_v10, %v1653_v2 }
 0x4ce   :  { %v623_v12 = vpop.permute.xlu1 %622 }
 0x4cf   :  { %v669_v13 = vadd.f32 %v623_v12, %v1655_v3 }
 0x4d1   :  { %v684_v15 = vpack.c.bf16 %v669_v13, %v668_v5 }
 0x4d3   :  { %v694_v38 = vsel %vm692_vm2, %v684_v15, 0 }
 0x4d4   :  { %724 = vmatpush.bf16.xpose.msrb.mxu2 %v694_v38  ;;  %1328 = vmatpush.bf16.xpose.msrb.mxu3 %v694_v38 }
 0x4db   :  { %1224 = vmatmul.msk.bf16.vlgmr.msrb.gmra.mxu2 %vm692_vm2, %v684_v15  ;;  %1231 = vmatmul.msk.bf16.vlgmr.msrb.gmra.mxu3 %vm692_vm2, %v1725_v31 }
 0x4eb   :  { %1225 = vmatmul.msk.bf16.gmra.mxu2 %vm692_vm2, %v685_v9 }
 0x4fb   :  { %1226 = vmatmul.msk.bf16.gmra.mxu2 %vm692_vm2, %v686_v43 }
 0x50b   :  { %1227 = vmatmul.msk.bf16.gmra.mxu2 %vm692_vm2, %v687_v61 }
 0x51b   :  { %1228 = vmatmul.msk.bf16.gmra.mxu2 %vm692_vm2, %v688_v56 }
 0x52b   :  { %1229 = vmatmul.msk.bf16.gmra.mxu2 %vm692_vm2, %v689_v52 }
 0x53b   :  { %1230 = vmatmul.msk.bf16.gmra.mxu2 %vm692_vm2, %v690_v42 }
 0x55e   :  { %v726_v2 = vpop.f32.mrf.mxu2  ;;  %v761_v3 = vpop.f32.mrf.mxu3 }
 0x55f   :  { %v1232_v4 = vmul.f32 -1.442695, %v726_v2  ;;  %v1246_v16 = vmul.f32 -1.442695, %v761_v3 }
 0x561   :  { %1366 = vpow2.f32 %v1232_v4 }
 0x562   :  { %1368 = vpow2.f32 %v1246_v16 }
 0x566   :  { %v728_v17 = vpop.f32.mrf.mxu2  ;;  %v763_v18 = vpop.f32.mrf.mxu3 }
 0x567   :  { %v1367_v19 = vpop.eup %1366  ;;  %v1233_v20 = vmul.f32 -1.442695, %v728_v17  ;;  %v1247_v24 = vmul.f32 -1.442695, %v763_v18 }
 0x568   :  { %v1369_v21 = vpop.eup %1368  ;;  %v814_v23 = vadd.f32 1.0, %v1367_v19 }
 0x569   :  { %v1761_v25 = vadd.f32 1.0, %v1369_v21  ;;  %1370 = vpow2.f32 %v1233_v20 }
 0x56a   :  { %1372 = vrcp.f32 %v814_v23  ;;  %vm835_vm3 = vweird.f32 %v814_v23  ;;  %v839_v49 = vand.u32 2147483647, %v814_v23  ;;  %v841_v50 = vand.u32 2147483648, %v814_v23 }
 0x56b   :  { %1374 = vrcp.f32 %v1761_v25  ;;  %vm1045_vm5 = vweird.f32 %v1761_v25  ;;  %v1049_v55 = vand.u32 2147483647, %v1761_v25  ;;  %v1051_v56 = vand.u32 2147483648, %v1761_v25 }
 0x56c   :  { %1376 = vpow2.f32 %v1247_v24  ;;  %vm1778_vm6 = vcmp.eq.f32.partialorder %v839_v49, 8.507059e+37  ;;  %v842_v58 = vor.u32 1.1754944e-38, %v841_v50 }
 0x56d   :  { %v1052_v16 = vor.u32 1.1754944e-38, %v1051_v56  ;;  %vm1050_vm1 = vcmp.eq.f32.partialorder %v1049_v55, 8.507059e+37 }
 0x56e   :  { %v731_v26 = vpop.f32.mrf.mxu2 }
 0x56f   :  { %v1371_v27 = vpop.eup %1370  ;;  %v1234_v28 = vmul.f32 -1.442695, %v731_v26 }
 0x570   :  { %v1373_v29 = vpop.eup %1372  ;;  %v815_v30 = vadd.f32 1.0, %v1371_v27 }
 0x571   :  { %v1764_v31 = vpop.eup %1374  ;;  %v831_v32 = vmul.f32 %v1373_v29, %v814_v23  ;;  %1378 = vpow2.f32 %v1234_v28  ;;  %vm836_vm4 = vweird.f32 %v1373_v29 }
 0x572   :  { %v1377_v33 = vpop.eup %1376  ;;  %v1041_v34 = vmul.f32 %v1764_v31, %v1761_v25  ;;  %1380 = vrcp.f32 %v815_v30  ;;  %v854_v8 = vand.u32 2147483647, %v815_v30  ;;  %v856_v54 = vand.u32 2147483648, %v815_v30  ;;  %vm1786_vm8 = vmor %vm835_vm3, %vm836_vm4 }
 0x573   :  { %v832_v35 = vsub.f32 1.0, %v831_v32  ;;  %v1768_v14 = vadd.f32 1.0, %v1377_v33  ;;  %vm1046_vm7 = vweird.f32 %v1764_v31  ;;  %vm850_vm9 = vweird.f32 %v815_v30 }
 0x574   :  { %v1042_v42 = vsub.f32 1.0, %v1041_v34  ;;  %vm1790_vm11 = vcmp.eq.f32.partialorder %v854_v8, 8.507059e+37  ;;  %v857_v41 = vor.u32 1.1754944e-38, %v856_v54  ;;  %vm1808_vm15 = vmor %vm1045_vm5, %vm1046_vm7 }
 0x575   :  { %1382 = vrcp.f32 %v1768_v14  ;;  %v833_v22 = vmul.f32 %v1373_v29, %v832_v35  ;;  %vm1060_vm12 = vweird.f32 %v1768_v14  ;;  %v1066_v39 = vand.u32 2147483648, %v1768_v14 }
 0x576   :  { %v733_v44 = vpop.f32.mrf.mxu2  ;;  %v1043_v53 = vmul.f32 %v1764_v31, %v1042_v42  ;;  %v1064_v10 = vand.u32 2147483647, %v1768_v14 }
 0x577   :  { %v1379_v46 = vpop.eup %1378  ;;  %v1235_v47 = vmul.f32 -1.442695, %v733_v44  ;;  %v834_v11 = vadd.f32 %v1373_v29, %v833_v22  ;;  %v1067_v18 = vor.u32 1.1754944e-38, %v1066_v39 }
 0x578   :  { %v1381_v48 = vpop.eup %1380  ;;  %v1771_v51 = vadd.f32 1.0, %v1379_v46  ;;  %v1044_v63 = vadd.f32 %v1764_v31, %v1043_v53  ;;  %vm1065_vm2 = vcmp.eq.f32.partialorder %v1064_v10, 8.507059e+37 }
 0x579   :  { %v846_v52 = vmul.f32 %v1381_v48, %v815_v30  ;;  %1384 = vpow2.f32 %v1235_v47  ;;  %vm851_vm10 = vweird.f32 %v1381_v48  ;;  %v838_v62 = vsel %vm1786_vm8, %v1373_v29, %v834_v11 }
 0x57a   :  { %1386 = vrcp.f32 %v1771_v51  ;;  %vm852_vm13 = vmor %vm850_vm9, %vm851_vm10  ;;  %v843_v5 = vsel %vm1778_vm6, %v842_v58, %v838_v62  ;;  %v1048_v2 = vsel %vm1808_vm15, %v1764_v31, %v1044_v63  ;;  %v869_v34 = vand.u32 2147483647, %v1771_v51 }
 0x57b   :  { %v1383_v7 = vpop.eup %1382  ;;  %v847_v45 = vsub.f32 1.0, %v846_v52  ;;  %v1053_v21 = vsel %vm1050_vm1, %v1052_v16, %v1048_v2  ;;  %v871_v35 = vand.u32 2147483648, %v1771_v51  ;;  %vm865_vm4 = vweird.f32 %v1771_v51 }
 0x57c   :  { %v1056_v36 = vmul.f32 %v1383_v7, %v1768_v14  ;;  %vm1061_vm14 = vweird.f32 %v1383_v7  ;;  %vm870_vm8 = vcmp.eq.f32.partialorder %v869_v34, 8.507059e+37 }
 0x57d   :  { %v848_v60 = vmul.f32 %v1381_v48, %v847_v45  ;;  %vm1062_vm0 = vmor %vm1060_vm12, %vm1061_vm14  ;;  %v872_v8 = vor.u32 1.1754944e-38, %v871_v35 }
 0x57e   :  { %v1057_v43 = vsub.f32 1.0, %v1056_v36  ;;  %v736_v37 = vpop.f32.mrf.mxu2 }
 0x57f   :  { %v1385_v0 = vpop.eup %1384  ;;  %v849_v1 = vadd.f32 %v1381_v48, %v848_v60  ;;  %v1236_v40 = vmul.f32 -1.442695, %v736_v37 }
 0x580   :  { %v1799_v9 = vpop.eup %1386  ;;  %v1058_v6 = vmul.f32 %v1383_v7, %v1057_v43  ;;  %v817_v12 = vadd.f32 1.0, %v1385_v0 }
 0x581   :  { %v853_v15 = vsel %vm852_vm13, %v1381_v48, %v849_v1  ;;  %v861_v38 = vmul.f32 %v1799_v9, %v1771_v51  ;;  %1388 = vpow2.f32 %v1236_v40  ;;  %vm866_vm3 = vweird.f32 %v1799_v9 }
 0x582   :  { %v858_v3 = vsel %vm1790_vm11, %v857_v41, %v853_v15  ;;  %v1059_v4 = vadd.f32 %v1383_v7, %v1058_v6  ;;  %1390 = vrcp.f32 %v817_v12  ;;  %v886_v14 = vand.u32 2147483648, %v817_v12  ;;  %vm1830_vm6 = vmor %vm865_vm4, %vm866_vm3 }
 0x583   :  { %v1273_v17 = vpack.c.bf16 %v858_v3, %v843_v5  ;;  %v862_v19 = vsub.f32 1.0, %v861_v38  ;;  %v884_v42 = vand.u32 2147483647, %v817_v12  ;;  %vm880_vm7 = vweird.f32 %v817_v12 }
 0x584   :  { %v1063_v20 = vsel %vm1062_vm0, %v1383_v7, %v1059_v4  ;;  %v887_v51 = vor.u32 1.1754944e-38, %v886_v14 }
 0x585   :  { %1274 = vst [vmem:[#allocation2] sm:$0xff] %v1273_v17   ;;  %v1068_v23 = vsel %vm1065_vm2, %v1067_v18, %v1063_v20  ;;  %v863_v27 = vmul.f32 %v1799_v9, %v862_v19  ;;  %vm885_vm10 = vcmp.eq.f32.partialorder %v884_v42, 8.507059e+37 }
 0x586   :  { %v1308_v24 = vpack.c.bf16 %v1068_v23, %v1053_v21  ;;  %v738_v25 = vpop.f32.mrf.mxu2 }
 0x587   :  { %v1389_v26 = vpop.eup %1388  ;;  %v1237_v28 = vmul.f32 -1.442695, %v738_v25  ;;  %v864_v32 = vadd.f32 %v1799_v9, %v863_v27 }
 0x588   :  { %v1391_v29 = vpop.eup %1390  ;;  %1316 = vst [vmem:[#allocation2 + $0x38] sm:$0xff] %v1308_v24   ;;  %v1822_v30 = vadd.f32 1.0, %v1389_v26 }
 0x589   :  { %v876_v31 = vmul.f32 %v1391_v29, %v817_v12  ;;  %1392 = vpow2.f32 %v1237_v28  ;;  %vm881_vm5 = vweird.f32 %v1391_v29  ;;  %v868_v48 = vsel %vm1830_vm6, %v1799_v9, %v864_v32 }
 0x58a   :  { %1394 = vrcp.f32 %v1822_v30  ;;  %vm882_vm9 = vmor %vm880_vm7, %vm881_vm5  ;;  %v873_v7 = vsel %vm870_vm8, %v872_v8, %v868_v48  ;;  %v899_v43 = vand.u32 2147483647, %v1822_v30  ;;  %v901_v37 = vand.u32 2147483648, %v1822_v30 }
 0x58b   :  { %v877_v33 = vsub.f32 1.0, %v876_v31  ;;  %vm895_vm12 = vweird.f32 %v1822_v30 }
 0x58c   :  { %vm900_vm0 = vcmp.eq.f32.partialorder %v899_v43, 8.507059e+37  ;;  %v902_v15 = vor.u32 1.1754944e-38, %v901_v37 }
 0x58d   :  { %v878_v22 = vmul.f32 %v1391_v29, %v877_v33 }
 0x58e   :  { %v741_v46 = vpop.f32.mrf.mxu2 }
 0x58f   :  { %v1393_v47 = vpop.eup %1392  ;;  %v879_v49 = vadd.f32 %v1391_v29, %v878_v22  ;;  %v1238_v50 = vmul.f32 -1.442695, %v741_v46 }
 0x590   :  { %v1395_v52 = vpop.eup %1394  ;;  %v819_v11 = vadd.f32 1.0, %v1393_v47 }
 0x591   :  { %v883_v53 = vsel %vm882_vm9, %v1391_v29, %v879_v49  ;;  %v891_v54 = vmul.f32 %v1395_v52, %v1822_v30  ;;  %1396 = vpow2.f32 %v1238_v50  ;;  %vm896_vm11 = vweird.f32 %v1395_v52 }
 0x592   :  { %v888_v55 = vsel %vm885_vm10, %v887_v51, %v883_v53  ;;  %1398 = vrcp.f32 %v819_v11  ;;  %v916_v0 = vand.u32 2147483648, %v819_v11  ;;  %v914_v39 = vand.u32 2147483647, %v819_v11  ;;  %vm1844_vm14 = vmor %vm895_vm12, %vm896_vm11 }
 0x593   :  { %v1278_v56 = vpack.c.bf16 %v888_v55, %v873_v7  ;;  %v892_v45 = vsub.f32 1.0, %v891_v54  ;;  %vm910_vm15 = vweird.f32 %v819_v11 }
 0x594   :  { %v917_v38 = vor.u32 1.1754944e-38, %v916_v0  ;;  %vm915_vm2 = vcmp.eq.f32.partialorder %v914_v39, 8.507059e+37 }
 0x595   :  { %1310 = vst [vmem:[#allocation2 + $0x8] sm:$0xff] %v1278_v56   ;;  %v893_v36 = vmul.f32 %v1395_v52, %v892_v45 }
 0x596   :  { %v743_v57 = vpop.f32.mrf.mxu2 }
 0x597   :  { %v1397_v58 = vpop.eup %1396  ;;  %v1239_v59 = vmul.f32 -1.442695, %v743_v57  ;;  %v894_v63 = vadd.f32 %v1395_v52, %v893_v36 }
 0x598   :  { %v1399_v60 = vpop.eup %1398  ;;  %v1838_v61 = vadd.f32 1.0, %v1397_v58 }
 0x599   :  { %v906_v62 = vmul.f32 %v1399_v60, %v819_v11  ;;  %1400 = vpow2.f32 %v1239_v59  ;;  %vm911_vm13 = vweird.f32 %v1399_v60  ;;  %v898_v10 = vsel %vm1844_vm14, %v1395_v52, %v894_v63 }
 0x59a   :  { %1402 = vrcp.f32 %v1838_v61  ;;  %vm912_vm1 = vmor %vm910_vm15, %vm911_vm13  ;;  %v903_v16 = vsel %vm900_vm0, %v902_v15, %v898_v10  ;;  %v929_v30 = vand.u32 2147483647, %v1838_v61  ;;  %v931_v31 = vand.u32 2147483648, %v1838_v61 }
 0x59b   :  { %v907_v41 = vsub.f32 1.0, %v906_v62  ;;  %vm925_vm4 = vweird.f32 %v1838_v61 }
 0x59c   :  { %vm930_vm8 = vcmp.eq.f32.partialorder %v929_v30, 8.507059e+37  ;;  %v932_v48 = vor.u32 1.1754944e-38, %v931_v31 }
 0x59d   :  { %v908_v1 = vmul.f32 %v1399_v60, %v907_v41 }
 0x59e   :  { %v746_v9 = vpop.f32.mrf.mxu2 }
 0x59f   :  { %v1401_v6 = vpop.eup %1400  ;;  %v909_v12 = vadd.f32 %v1399_v60, %v908_v1  ;;  %v1240_v5 = vmul.f32 -1.442695, %v746_v9 }
 0x5a0   :  { %v1403_v13 = vpop.eup %1402  ;;  %v821_v2 = vadd.f32 1.0, %v1401_v6 }
 0x5a1   :  { %v913_v3 = vsel %vm912_vm1, %v1399_v60, %v909_v12  ;;  %v921_v4 = vmul.f32 %v1403_v13, %v1838_v61  ;;  %1404 = vpow2.f32 %v1240_v5  ;;  %vm926_vm3 = vweird.f32 %v1403_v13 }
 0x5a2   :  { %v918_v17 = vsel %vm915_vm2, %v917_v38, %v913_v3  ;;  %1406 = vrcp.f32 %v821_v2  ;;  %v946_v32 = vand.u32 2147483648, %v821_v2  ;;  %v944_v34 = vand.u32 2147483647, %v821_v2  ;;  %vm1857_vm6 = vmor %vm925_vm4, %vm926_vm3 }
 0x5a3   :  { %v1283_v18 = vpack.c.bf16 %v918_v17, %v903_v16  ;;  %v922_v19 = vsub.f32 1.0, %v921_v4  ;;  %vm940_vm7 = vweird.f32 %v821_v2 }
 0x5a4   :  { %v947_v49 = vor.u32 1.1754944e-38, %v946_v32  ;;  %vm945_vm10 = vcmp.eq.f32.partialorder %v944_v34, 8.507059e+37 }
 0x5a5   :  { %1311 = vst [vmem:[#allocation2 + $0x10] sm:$0xff] %v1283_v18   ;;  %v923_v23 = vmul.f32 %v1403_v13, %v922_v19 }
 0x5a6   :  { %v748_v20 = vpop.f32.mrf.mxu2 }
 0x5a7   :  { %v1405_v21 = vpop.eup %1404  ;;  %v1241_v24 = vmul.f32 -1.442695, %v748_v20  ;;  %v924_v28 = vadd.f32 %v1403_v13, %v923_v23 }
 0x5a8   :  { %v1407_v25 = vpop.eup %1406  ;;  %v1851_v26 = vadd.f32 1.0, %v1405_v21 }
 0x5a9   :  { %v936_v27 = vmul.f32 %v1407_v25, %v821_v2  ;;  %1408 = vpow2.f32 %v1241_v24  ;;  %vm941_vm5 = vweird.f32 %v1407_v25  ;;  %v928_v42 = vsel %vm1857_vm6, %v1403_v13, %v924_v28 }
 0x5aa   :  { %1410 = vrcp.f32 %v1851_v26  ;;  %vm942_vm9 = vmor %vm940_vm7, %vm941_vm5  ;;  %v933_v51 = vsel %vm930_vm8, %v932_v48, %v928_v42  ;;  %v959_v61 = vand.u32 2147483647, %v1851_v26  ;;  %v961_v62 = vand.u32 2147483648, %v1851_v26 }
 0x5ab   :  { %v937_v29 = vsub.f32 1.0, %v936_v27  ;;  %vm955_vm12 = vweird.f32 %v1851_v26 }
 0x5ac   :  { %vm960_vm0 = vcmp.eq.f32.partialorder %v959_v61, 8.507059e+37  ;;  %v962_v10 = vor.u32 1.1754944e-38, %v961_v62 }
 0x5ad   :  { %v938_v33 = vmul.f32 %v1407_v25, %v937_v29 }
 0x5ae   :  { %v751_v14 = vpop.f32.mrf.mxu2 }
 0x5af   :  { %v1409_v22 = vpop.eup %1408  ;;  %v939_v44 = vadd.f32 %v1407_v25, %v938_v33  ;;  %v1242_v46 = vmul.f32 -1.442695, %v751_v14 }
 0x5b0   :  { %v1411_v47 = vpop.eup %1410  ;;  %v823_v50 = vadd.f32 1.0, %v1409_v22 }
 0x5b1   :  { %v943_v52 = vsel %vm942_vm9, %v1407_v25, %v939_v44  ;;  %v951_v8 = vmul.f32 %v1411_v47, %v1851_v26  ;;  %1412 = vpow2.f32 %v1242_v46  ;;  %vm956_vm11 = vweird.f32 %v1411_v47 }
 0x5b2   :  { %v948_v11 = vsel %vm945_vm10, %v947_v49, %v943_v52  ;;  %1414 = vrcp.f32 %v823_v50  ;;  %v976_v63 = vand.u32 2147483648, %v823_v50  ;;  %v974_v43 = vand.u32 2147483647, %v823_v50  ;;  %vm1870_vm14 = vmor %vm955_vm12, %vm956_vm11 }
 0x5b3   :  { %v1288_v53 = vpack.c.bf16 %v948_v11, %v933_v51  ;;  %v952_v54 = vsub.f32 1.0, %v951_v8  ;;  %vm970_vm15 = vweird.f32 %v823_v50 }
 0x5b4   :  { %v977_v12 = vor.u32 1.1754944e-38, %v976_v63  ;;  %vm975_vm2 = vcmp.eq.f32.partialorder %v974_v43, 8.507059e+37 }
 0x5b5   :  { %1312 = vst [vmem:[#allocation2 + $0x18] sm:$0xff] %v1288_v53   ;;  %v953_v56 = vmul.f32 %v1411_v47, %v952_v54 }
 0x5b6   :  { %v753_v7 = vpop.f32.mrf.mxu2 }
 0x5b7   :  { %v1413_v55 = vpop.eup %1412  ;;  %v1243_v45 = vmul.f32 -1.442695, %v753_v7  ;;  %v954_v59 = vadd.f32 %v1411_v47, %v953_v56 }
 0x5b8   :  { %v1415_v57 = vpop.eup %1414  ;;  %v1864_v58 = vadd.f32 1.0, %v1413_v55 }
 0x5b9   :  { %v966_v36 = vmul.f32 %v1415_v57, %v823_v50  ;;  %1416 = vpow2.f32 %v1243_v45  ;;  %vm971_vm13 = vweird.f32 %v1415_v57  ;;  %v958_v39 = vsel %vm1870_vm14, %v1411_v47, %v954_v59 }
 0x5ba   :  { %1418 = vrcp.f32 %v1864_v58  ;;  %vm972_vm1 = vmor %vm970_vm15, %vm971_vm13  ;;  %v963_v38 = vsel %vm960_vm0, %v962_v10, %v958_v39  ;;  %vm985_vm4 = vweird.f32 %v1864_v58  ;;  %v991_v26 = vand.u32 2147483648, %v1864_v58 }
 0x5bb   :  { %v967_v60 = vsub.f32 1.0, %v966_v36  ;;  %v989_v28 = vand.u32 2147483647, %v1864_v58 }
 0x5bc   :  { %v992_v35 = vor.u32 1.1754944e-38, %v991_v26 }
 0x5bd   :  { %v968_v41 = vmul.f32 %v1415_v57, %v967_v60  ;;  %vm990_vm9 = vcmp.eq.f32.partialorder %v989_v28, 8.507059e+37 }
 0x5be   :  { %v756_v0 = vpop.f32.mrf.mxu2 }
 0x5bf   :  { %v1417_v1 = vpop.eup %1416  ;;  %v969_v40 = vadd.f32 %v1415_v57, %v968_v41  ;;  %v1244_v9 = vmul.f32 -1.442695, %v756_v0 }
 0x5c0   :  { %v1419_v6 = vpop.eup %1418  ;;  %v825_v5 = vadd.f32 1.0, %v1417_v1 }
 0x5c1   :  { %v973_v13 = vsel %vm972_vm1, %v1415_v57, %v969_v40  ;;  %v981_v15 = vmul.f32 %v1419_v6, %v1864_v58  ;;  %1420 = vpow2.f32 %v1244_v9  ;;  %vm986_vm3 = vweird.f32 %v1419_v6 }
 0x5c2   :  { %v978_v2 = vsel %vm975_vm2, %v977_v12, %v973_v13  ;;  %1422 = vrcp.f32 %v825_v5  ;;  %v1006_v27 = vand.u32 2147483648, %v825_v5  ;;  %v1004_v30 = vand.u32 2147483647, %v825_v5  ;;  %vm987_vm6 = vmor %vm985_vm4, %vm986_vm3 }
 0x5c3   :  { %v1293_v3 = vpack.c.bf16 %v978_v2, %v963_v38  ;;  %v982_v4 = vsub.f32 1.0, %v981_v15  ;;  %vm1000_vm7 = vweird.f32 %v825_v5 }
 0x5c4   :  { %v1007_v14 = vor.u32 1.1754944e-38, %v1006_v27  ;;  %vm1005_vm10 = vcmp.eq.f32.partialorder %v1004_v30, 8.507059e+37 }
 0x5c5   :  { %1313 = vst [vmem:[#allocation2 + $0x20] sm:$0xff] %v1293_v3   ;;  %v983_v18 = vmul.f32 %v1419_v6, %v982_v4 }
 0x5c6   :  { %v758_v16 = vpop.f32.mrf.mxu2 }
 0x5c7   :  { %v1421_v17 = vpop.eup %1420  ;;  %v1245_v19 = vmul.f32 -1.442695, %v758_v16  ;;  %v984_v24 = vadd.f32 %v1419_v6, %v983_v18 }
 0x5c8   :  { %v1423_v20 = vpop.eup %1422  ;;  %v826_v21 = vadd.f32 1.0, %v1421_v17 }
 0x5c9   :  { %v996_v23 = vmul.f32 %v1423_v20, %v825_v5  ;;  %1424 = vpow2.f32 %v1245_v19  ;;  %vm1001_vm5 = vweird.f32 %v1423_v20  ;;  %v988_v32 = vsel %vm987_vm6, %v1419_v6, %v984_v24 }
 0x5ca   :  { %1426 = vrcp.f32 %v826_v21  ;;  %vm1002_vm8 = vmor %vm1000_vm7, %vm1001_vm5  ;;  %v993_v46 = vsel %vm990_vm9, %v992_v35, %v988_v32  ;;  %vm1015_vm12 = vweird.f32 %v826_v21  ;;  %v1021_v53 = vand.u32 2147483648, %v826_v21 }
 0x5cb   :  { %v997_v25 = vsub.f32 1.0, %v996_v23  ;;  %v1019_v7 = vand.u32 2147483647, %v826_v21 }
 0x5cc   :  { %v1022_v58 = vor.u32 1.1754944e-38, %v1021_v53 }
 0x5cd   :  { %v998_v29 = vmul.f32 %v1423_v20, %v997_v25  ;;  %vm1020_vm1 = vcmp.eq.f32.partialorder %v1019_v7, 8.507059e+37 }
 0x5cf   :  { %v1425_v31 = vpop.eup %1424  ;;  %v999_v33 = vadd.f32 %v1423_v20, %v998_v29 }
 0x5d0   :  { %v1427_v34 = vpop.eup %1426  ;;  %v827_v22 = vadd.f32 1.0, %v1425_v31 }
 0x5d1   :  { %v1003_v42 = vsel %vm1002_vm8, %v1423_v20, %v999_v33  ;;  %v1011_v44 = vmul.f32 %v1427_v34, %v826_v21  ;;  %vm1016_vm11 = vweird.f32 %v1427_v34 }
 0x5d2   :  { %v1008_v47 = vsel %vm1005_vm10, %v1007_v14, %v1003_v42  ;;  %1428 = vrcp.f32 %v827_v22  ;;  %v1036_v54 = vand.u32 2147483648, %v827_v22  ;;  %v1034_v56 = vand.u32 2147483647, %v827_v22  ;;  %vm1017_vm14 = vmor %vm1015_vm12, %vm1016_vm11 }
 0x5d3   :  { %v1298_v48 = vpack.c.bf16 %v1008_v47, %v993_v46  ;;  %v1012_v49 = vsub.f32 1.0, %v1011_v44  ;;  %vm1030_vm15 = vweird.f32 %v827_v22 }
 0x5d4   :  { %v1037_v36 = vor.u32 1.1754944e-38, %v1036_v54  ;;  %vm1035_vm2 = vcmp.eq.f32.partialorder %v1034_v56, 8.507059e+37 }
 0x5d5   :  { %1314 = vst [vmem:[#allocation2 + $0x28] sm:$0xff] %v1298_v48   ;;  %v1013_v50 = vmul.f32 %v1427_v34, %v1012_v49 }
 0x5d7   :  { %v1014_v51 = vadd.f32 %v1427_v34, %v1013_v50 }
 0x5d8   :  { %v1429_v52 = vpop.eup %1428 }
 0x5d9   :  { %v1026_v8 = vmul.f32 %v1429_v52, %v827_v22  ;;  %vm1031_vm13 = vweird.f32 %v1429_v52  ;;  %v1018_v45 = vsel %vm1017_vm14, %v1427_v34, %v1014_v51 }
 0x5da   :  { %vm1032_vm0 = vmor %vm1030_vm15, %vm1031_vm13  ;;  %v1023_v60 = vsel %vm1020_vm1, %v1022_v58, %v1018_v45 }
 0x5db   :  { %v1027_v11 = vsub.f32 1.0, %v1026_v8 }
 0x5dd   :  { %v1028_v55 = vmul.f32 %v1429_v52, %v1027_v11 }
 0x5df   :  { %v1029_v57 = vadd.f32 %v1429_v52, %v1028_v55 }
 0x5e1   :  { %v1033_v59 = vsel %vm1032_vm0, %v1429_v52, %v1029_v57 }
 0x5e2   :  { %v1038_v61 = vsel %vm1035_vm2, %v1037_v36, %v1033_v59 }
 0x5e3   :  { %v1303_v62 = vpack.c.bf16 %v1038_v61, %v1023_v60 }
 0x5e5   :  { %1315 = vst [vmem:[#allocation2 + $0x30] sm:$0xff] %v1303_v62  }
 0x5e6   :  { %1114 = dma.vmem_to_hbm [thread:$0]  %s1107_s9, 1024, %s1109_s15, [#allocation3], %s1459_s0, %s1459_s0, %s1460_s16  }
 0x5e7   :  { %1454 = dma.done.wait [#allocation3], 1024  }
 0x5e8   :  { %1455 = vsyncadd [#allocation3], 4294966272 }
 0x5e9   :  { %1119 = vsyncpa [#allocation3], 1 }

</bundles_post_ra>
